<compile_context>
chip_gen: v6e
topology: v6e:2x2x1
jax: 0.10.0
libtpu: 0.0.40
codegen_flags: <defaults>
</compile_context>

<pallas_src>
import math

import jax
import jax.numpy as jnp
from jax.experimental import pallas as pl
from jax.experimental.pallas import tpu as pltpu


def _make_basic_block_kernel(H, batch_block, compute_dtype):
    """Kernel closure over the static per-image height / images-per-step.

    Refs (M = batch_block * H, WC = W * Cpad):
      x_ref  : (M, WC)      lane-packed input rows, lane index = w*Cpad + c
      t*_ref : (3, WC, WC)  block-Toeplitz conv weights (BN scale folded in)
      b*_ref : (1, WC)      folded BatchNorm bias tiled over W (float32)
      o_ref  : (M, WC)      lane-dense output rows
    """

    def kernel(x_ref, t1_ref, b1_ref, t2_ref, b2_ref, o_ref):
        M, WC = o_ref.shape
        x = x_ref[...]

        # Per-image vertical-boundary masks.  Only needed when several images
        # are stacked along M; for batch_block == 1 the shifted-in zero row
        # already provides the top/bottom zero padding.
        if batch_block > 1:
            rows = jax.lax.broadcasted_iota(jnp.int32, (M, WC), 0)
            not_top = (rows % H) != 0
            not_bot = (rows % H) != (H - 1)

        zero_row = jnp.zeros((1, WC), compute_dtype)

        def shift_down(v):
            # s[r] = v[r-1]; zero flows in at every image's top row.
            s = jnp.concatenate([zero_row, v[:M - 1, :]], axis=0)
            if batch_block > 1:
                s = jnp.where(not_top, s, jnp.zeros_like(s))
            return s

        def shift_up(v):
            # s[r] = v[r+1]; zero flows in at every image's bottom row.
            s = jnp.concatenate([v[1:, :], zero_row], axis=0)
            if batch_block > 1:
                s = jnp.where(not_bot, s, jnp.zeros_like(s))
            return s

        # ---- conv1 (bn1 scale folded into t1): 3 dense MXU matmuls
        acc = jnp.dot(shift_down(x), t1_ref[0], preferred_element_type=jnp.float32)
        acc = acc + jnp.dot(x, t1_ref[1], preferred_element_type=jnp.float32)
        acc = acc + jnp.dot(shift_up(x), t1_ref[2], preferred_element_type=jnp.float32)

        # ---- bn1 bias + relu; intermediate stays register-resident.
        mid = jnp.maximum(acc + b1_ref[...], 0.0).astype(compute_dtype)

        # ---- conv2 (bn2 scale folded into t2)
        acc2 = jnp.dot(shift_down(mid), t2_ref[0], preferred_element_type=jnp.float32)
        acc2 = acc2 + jnp.dot(mid, t2_ref[1], preferred_element_type=jnp.float32)
        acc2 = acc2 + jnp.dot(shift_up(mid), t2_ref[2], preferred_element_type=jnp.float32)

        # ---- bn2 bias + residual (downsample is None) + relu, lane-dense store
        out = jnp.maximum(acc2 + b2_ref[...] + x.astype(jnp.float32), 0.0)
        o_ref[...] = out.astype(o_ref.dtype)

    return kernel


def _fold_bn(gamma, beta, mean, var, eps=1e-5):
    scale = (gamma / jnp.sqrt(var + eps)).astype(jnp.float32)
    bias = (beta - mean * scale).astype(jnp.float32)
    return scale, bias


def _toeplitz_conv_weights(w_oihw, out_scale, W):
    """(Cout, Cin, 3, 3) OIHW kernel -> (3, W*Cin, W*Cout) block-Toeplitz.

    T[dy][(w+dx-1)*Cin + ci, w*Cout + co] = w[co, ci, dy, dx] * out_scale[co]
    for 0 <= w+dx-1 < W; out-of-range taps fall off the (clipped) band, which
    reproduces the horizontal zero padding of conv3x3.
    """
    Cout, Cin, KH, KW = w_oihw.shape
    w = (w_oihw * out_scale[:, None, None, None]).astype(jnp.float32)
    w = jnp.transpose(w, (2, 3, 1, 0))          # (KH, KW, Cin, Cout)
    bands = []
    for dy in range(KH):
        t = jnp.zeros((W * Cin, W * Cout), jnp.float32)
        for dx in range(KW):
            band = jnp.eye(W, k=-(dx - 1), dtype=jnp.float32)
            t = t + jnp.kron(band, w[dy, dx])
        bands.append(t)
    return jnp.stack(bands)                     # (3, W*Cin, W*Cout)


def _pick_batch_block(N, H, target_rows=256):
    """How many images to fold into the matmul M dimension per grid step."""
    b = max(1, min(N, max(1, target_rows // max(H, 1))))
    # Keep >= 2 grid steps when the batch allows it (feeds both v7x TCs and
    # the software pipeline).
    while b > 1 and -(-N // b) < 2:
        b -= 1
    n_padded = -(-N // b) * b
    return b, n_padded


def _vmem_limit_bytes(M, WC, compute_bytes):
    weights = 2 * 3 * WC * WC * compute_bytes * 2   # t1 + t2, x2 pipeline bufs
    io = 2 * M * WC * compute_bytes * 2             # x block + out block, x2 bufs
    biases = 2 * WC * 4 * 2
    est = weights + io + biases
    return int(min(128 * 2**20, max(32 * 2**20, 2 * est)))


def basic_block_forward(x_nchw, params, eps=1e-5, compute_dtype=jnp.bfloat16,
                        batch_block=None):
    """x_nchw: (N, C, H, W). Returns (N, C, H, W) in x's dtype."""
    N, C, H, W = x_nchw.shape

    # --- lane padding: pad channels so W*Cp is a multiple of 128 (lane-dense
    # stores, MXU-aligned K/N).  Padded channels carry zero weights / zero BN
    # scale+bias, so they stay exactly zero and are sliced off at the end.
    c_quantum = 128 // math.gcd(W, 128)
    Cp = int(-(-C // c_quantum) * c_quantum)
    WC = W * Cp

    # --- batch blocking: fold several images into the matmul M dimension.
    if batch_block is None:
        batch_block, Np = _pick_batch_block(N, H)
    else:
        Np = -(-N // batch_block) * batch_block
    M = batch_block * H
    grid = Np // batch_block
    # TODO(synk): support H with (batch_block*H) % 8 != 0 via halo'd windows.
    assert (M % 8 == 0) or grid == 1, "row block must be sublane-aligned"

    # --- fold BN into conv weights (scale) and a per-channel bias.
    s1, b1 = _fold_bn(*params["bn1"], eps=eps)
    s2, b2 = _fold_bn(*params["bn2"], eps=eps)
    s1 = jnp.pad(s1, (0, Cp - C)); b1 = jnp.pad(b1, (0, Cp - C))
    s2 = jnp.pad(s2, (0, Cp - C)); b2 = jnp.pad(b2, (0, Cp - C))
    w1 = jnp.pad(params["w1"], ((0, Cp - C), (0, Cp - C), (0, 0), (0, 0)))
    w2 = jnp.pad(params["w2"], ((0, Cp - C), (0, Cp - C), (0, 0), (0, 0)))

    t1 = _toeplitz_conv_weights(w1, s1, W).astype(compute_dtype)
    t2 = _toeplitz_conv_weights(w2, s2, W).astype(compute_dtype)
    b1_t = jnp.tile(b1, W).reshape(1, WC).astype(jnp.float32)
    b2_t = jnp.tile(b2, W).reshape(1, WC).astype(jnp.float32)

    # NCHW -> lane-packed rows (Np*H, W*Cp).  No halo rows: vertical padding
    # is synthesized in-kernel, so this is the only HBM pass over x.
    x_rows = jnp.transpose(x_nchw, (0, 2, 3, 1))
    x_rows = jnp.pad(x_rows, ((0, Np - N), (0, 0), (0, 0), (0, Cp - C)))
    x_rows = x_rows.reshape(Np * H, WC).astype(compute_dtype)

    compute_bytes = jnp.dtype(compute_dtype).itemsize
    vmem_limit = _vmem_limit_bytes(M, WC, compute_bytes)

    kernel = _make_basic_block_kernel(H, batch_block, compute_dtype)

    out_rows = pl.pallas_call(
        kernel,
        out_shape=jax.ShapeDtypeStruct((Np * H, WC), compute_dtype),
        grid_spec=pltpu.PrefetchScalarGridSpec(
            num_scalar_prefetch=0,
            grid=(grid,),
            in_specs=[
                pl.BlockSpec((M, WC), lambda n: (n, 0)),
                # Constant index_map: weights/biases are DMA'd once and stay
                # resident in VMEM across all grid steps.
                pl.BlockSpec((3, WC, WC), lambda n: (0, 0, 0)),
                pl.BlockSpec((1, WC), lambda n: (0, 0)),
                pl.BlockSpec((3, WC, WC), lambda n: (0, 0, 0)),
                pl.BlockSpec((1, WC), lambda n: (0, 0)),
            ],
            out_specs=pl.BlockSpec((M, WC), lambda n: (n, 0)),
        ),
        compiler_params=pltpu.CompilerParams(
            dimension_semantics=("parallel",),
            vmem_limit_bytes=vmem_limit,
        ),
    )(x_rows, t1, b1_t, t2, b2_t)

    out = out_rows.reshape(Np, H, W, Cp)[:N, :, :, :C]
    return jnp.transpose(out, (0, 3, 1, 2)).astype(x_nchw.dtype)


def basic_block_reference(x, params, eps=1e-5):
    """Pure-JAX reference (lax conv) of the same forward, NCHW."""
    def conv(v, w):
        return jax.lax.conv_general_dilated(
            v, w, window_strides=(1, 1), padding=((1, 1), (1, 1)),
            dimension_numbers=("NCHW", "OIHW", "NCHW"))

    def bn(v, g, b, m, var):
        g, b, m, var = (t[None, :, None, None] for t in (g, b, m, var))
        return (v - m) / jnp.sqrt(var + eps) * g + b

    out = jax.nn.relu(bn(conv(x, params["w1"]), *params["bn1"]))
    out = bn(conv(out, params["w2"]), *params["bn2"])
    return jax.nn.relu(out + x)


if __name__ == "__main__":
    # Small shapes: inplanes == planes (stride=1, downsample=None).
    N, C, H, W = 2, 4, 16, 16

    key = jax.random.PRNGKey(0)
    keys = jax.random.split(key, 11)

    params = {
        "w1": 0.1 * jax.random.normal(keys[0], (C, C, 3, 3), jnp.float32),
        "w2": 0.1 * jax.random.normal(keys[1], (C, C, 3, 3), jnp.float32),
        # (gamma, beta, running_mean, running_var)
        "bn1": (jax.random.uniform(keys[2], (C,), minval=0.5, maxval=1.5),
                0.1 * jax.random.normal(keys[3], (C,)),
                0.1 * jax.random.normal(keys[4], (C,)),
                jax.random.uniform(keys[5], (C,), minval=0.5, maxval=1.5)),
        "bn2": (jax.random.uniform(keys[6], (C,), minval=0.5, maxval=1.5),
                0.1 * jax.random.normal(keys[7], (C,)),
                0.1 * jax.random.normal(keys[8], (C,)),
                jax.random.uniform(keys[9], (C,), minval=0.5, maxval=1.5)),
    }

    x = jax.random.normal(keys[10], (N, C, H, W), jnp.float32)

    ref = jax.block_until_ready(basic_block_reference(x, params))

    # f32 path: numerics must match the lax reference tightly.
    out_f32 = jax.block_until_ready(
        basic_block_forward(x, params, compute_dtype=jnp.float32))
    assert out_f32.shape == (N, C, H, W)
    assert jnp.allclose(out_f32, ref, atol=1e-4, rtol=1e-4), "f32 mismatch"

    # bf16 path (production default): f32 MXU accumulation, looser tolerance.
    out_bf16 = jax.block_until_ready(basic_block_forward(x, params))
    assert out_bf16.shape == (N, C, H, W)
    assert jnp.allclose(out_bf16, ref, atol=1e-1, rtol=5e-2), "bf16 mismatch"

    print("KERNEL_OK")
</pallas_src>

<mosaic_0001>
module attributes {stable_mosaic.version = 11 : i64} {
  func.func @kernel(%arg0: i32, %arg1: memref<16x128xf32, #tpu.memory_space<vmem>>, %arg2: memref<3x128x128xf32, #tpu.memory_space<vmem>>, %arg3: memref<1x128xf32, #tpu.memory_space<vmem>>, %arg4: memref<3x128x128xf32, #tpu.memory_space<vmem>>, %arg5: memref<1x128xf32, #tpu.memory_space<vmem>>, %arg6: memref<16x128xf32, #tpu.memory_space<vmem>>) attributes {dimension_semantics = [#tpu.dimension_semantics<parallel>], iteration_bounds = array<i64: 2>, scalar_prefetch = 0 : i64, scratch_operands = 0 : i64, tpu.core_type = #tpu.core_type<tc>, window_params = [{transform_indices = @transform_0, window_bounds = array<i64: 16, 128>}, {pipeline_mode = #tpu.pipeline_mode<synchronous>, transform_indices = @transform_1, window_bounds = array<i64: 3, 128, 128>}, {pipeline_mode = #tpu.pipeline_mode<synchronous>, transform_indices = @transform_2, window_bounds = array<i64: 1, 128>}, {pipeline_mode = #tpu.pipeline_mode<synchronous>, transform_indices = @transform_3, window_bounds = array<i64: 3, 128, 128>}, {pipeline_mode = #tpu.pipeline_mode<synchronous>, transform_indices = @transform_4, window_bounds = array<i64: 1, 128>}, {transform_indices = @transform_5, window_bounds = array<i64: 16, 128>}]} {
    %c0 = arith.constant 0 : index
    %c0_0 = arith.constant 0 : index
    %0 = vector.load %arg1[%c0, %c0_0] : memref<16x128xf32, #tpu.memory_space<vmem>>, vector<16x128xf32>
    %cst = arith.constant 0.000000e+00 : f32
    %1 = vector.broadcast %cst : f32 to vector<1x128xf32>
    %2 = vector.extract_strided_slice %0 {offsets = [0, 0], sizes = [15, 128], strides = [1, 1]} : vector<16x128xf32> to vector<15x128xf32>
    %3 = tpu.concatenate %1, %2 in 0 : vector<1x128xf32>, vector<15x128xf32> -> vector<16x128xf32>
    %c0_1 = arith.constant 0 : index
    %c0_2 = arith.constant 0 : index
    %c0_3 = arith.constant 0 : index
    %4 = vector.load %arg2[%c0_1, %c0_2, %c0_3] : memref<3x128x128xf32, #tpu.memory_space<vmem>>, vector<1x128x128xf32>
    %5 = vector.shape_cast %4 : vector<1x128x128xf32> to vector<128x128xf32>
    %cst_4 = arith.constant dense<0.000000e+00> : vector<16x128xf32>
    %6 = tpu.matmul %3, %5, %cst_4 {dimension_numbers = #tpu.dot_dimension_numbers<[1], [0], [0], [1], [0, 0, 1, 1], [], []>} : vector<16x128xf32>, vector<128x128xf32>, vector<16x128xf32> -> vector<16x128xf32>
    %c1 = arith.constant 1 : index
    %c0_5 = arith.constant 0 : index
    %c0_6 = arith.constant 0 : index
    %7 = vector.load %arg2[%c1, %c0_5, %c0_6] : memref<3x128x128xf32, #tpu.memory_space<vmem>>, vector<1x128x128xf32>
    %8 = vector.shape_cast %7 : vector<1x128x128xf32> to vector<128x128xf32>
    %cst_7 = arith.constant dense<0.000000e+00> : vector<16x128xf32>
    %9 = tpu.matmul %0, %8, %cst_7 {dimension_numbers = #tpu.dot_dimension_numbers<[1], [0], [0], [1], [0, 0, 1, 1], [], []>} : vector<16x128xf32>, vector<128x128xf32>, vector<16x128xf32> -> vector<16x128xf32>
    %10 = arith.addf %6, %9 : vector<16x128xf32>
    %11 = vector.extract_strided_slice %0 {offsets = [1, 0], sizes = [15, 128], strides = [1, 1]} : vector<16x128xf32> to vector<15x128xf32>
    %12 = tpu.concatenate %11, %1 in 0 : vector<15x128xf32>, vector<1x128xf32> -> vector<16x128xf32>
    %c2 = arith.constant 2 : index
    %c0_8 = arith.constant 0 : index
    %c0_9 = arith.constant 0 : index
    %13 = vector.load %arg2[%c2, %c0_8, %c0_9] : memref<3x128x128xf32, #tpu.memory_space<vmem>>, vector<1x128x128xf32>
    %14 = vector.shape_cast %13 : vector<1x128x128xf32> to vector<128x128xf32>
    %cst_10 = arith.constant dense<0.000000e+00> : vector<16x128xf32>
    %15 = tpu.matmul %12, %14, %cst_10 {dimension_numbers = #tpu.dot_dimension_numbers<[1], [0], [0], [1], [0, 0, 1, 1], [], []>} : vector<16x128xf32>, vector<128x128xf32>, vector<16x128xf32> -> vector<16x128xf32>
    %16 = arith.addf %10, %15 : vector<16x128xf32>
    %c0_11 = arith.constant 0 : index
    %c0_12 = arith.constant 0 : index
    %17 = vector.load %arg3[%c0_11, %c0_12] : memref<1x128xf32, #tpu.memory_space<vmem>>, vector<1x128xf32>
    %18 = vector.broadcast %17 : vector<1x128xf32> to vector<16x128xf32>
    %19 = arith.addf %16, %18 : vector<16x128xf32>
    %cst_13 = arith.constant 0.000000e+00 : f32
    %20 = vector.broadcast %cst_13 : f32 to vector<16x128xf32>
    %21 = arith.maximumf %19, %20 : vector<16x128xf32>
    %22 = vector.extract_strided_slice %21 {offsets = [0, 0], sizes = [15, 128], strides = [1, 1]} : vector<16x128xf32> to vector<15x128xf32>
    %23 = tpu.concatenate %1, %22 in 0 : vector<1x128xf32>, vector<15x128xf32> -> vector<16x128xf32>
    %c0_14 = arith.constant 0 : index
    %c0_15 = arith.constant 0 : index
    %c0_16 = arith.constant 0 : index
    %24 = vector.load %arg4[%c0_14, %c0_15, %c0_16] : memref<3x128x128xf32, #tpu.memory_space<vmem>>, vector<1x128x128xf32>
    %25 = vector.shape_cast %24 : vector<1x128x128xf32> to vector<128x128xf32>
    %cst_17 = arith.constant dense<0.000000e+00> : vector<16x128xf32>
    %26 = tpu.matmul %23, %25, %cst_17 {dimension_numbers = #tpu.dot_dimension_numbers<[1], [0], [0], [1], [0, 0, 1, 1], [], []>} : vector<16x128xf32>, vector<128x128xf32>, vector<16x128xf32> -> vector<16x128xf32>
    %c1_18 = arith.constant 1 : index
    %c0_19 = arith.constant 0 : index
    %c0_20 = arith.constant 0 : index
    %27 = vector.load %arg4[%c1_18, %c0_19, %c0_20] : memref<3x128x128xf32, #tpu.memory_space<vmem>>, vector<1x128x128xf32>
    %28 = vector.shape_cast %27 : vector<1x128x128xf32> to vector<128x128xf32>
    %cst_21 = arith.constant dense<0.000000e+00> : vector<16x128xf32>
    %29 = tpu.matmul %21, %28, %cst_21 {dimension_numbers = #tpu.dot_dimension_numbers<[1], [0], [0], [1], [0, 0, 1, 1], [], []>} : vector<16x128xf32>, vector<128x128xf32>, vector<16x128xf32> -> vector<16x128xf32>
    %30 = arith.addf %26, %29 : vector<16x128xf32>
    %31 = vector.extract_strided_slice %21 {offsets = [1, 0], sizes = [15, 128], strides = [1, 1]} : vector<16x128xf32> to vector<15x128xf32>
    %32 = tpu.concatenate %31, %1 in 0 : vector<15x128xf32>, vector<1x128xf32> -> vector<16x128xf32>
    %c2_22 = arith.constant 2 : index
    %c0_23 = arith.constant 0 : index
    %c0_24 = arith.constant 0 : index
    %33 = vector.load %arg4[%c2_22, %c0_23, %c0_24] : memref<3x128x128xf32, #tpu.memory_space<vmem>>, vector<1x128x128xf32>
    %34 = vector.shape_cast %33 : vector<1x128x128xf32> to vector<128x128xf32>
    %cst_25 = arith.constant dense<0.000000e+00> : vector<16x128xf32>
    %35 = tpu.matmul %32, %34, %cst_25 {dimension_numbers = #tpu.dot_dimension_numbers<[1], [0], [0], [1], [0, 0, 1, 1], [], []>} : vector<16x128xf32>, vector<128x128xf32>, vector<16x128xf32> -> vector<16x128xf32>
    %36 = arith.addf %30, %35 : vector<16x128xf32>
    %c0_26 = arith.constant 0 : index
    %c0_27 = arith.constant 0 : index
    %37 = vector.load %arg5[%c0_26, %c0_27] : memref<1x128xf32, #tpu.memory_space<vmem>>, vector<1x128xf32>
    %38 = vector.broadcast %37 : vector<1x128xf32> to vector<16x128xf32>
    %39 = arith.addf %36, %38 : vector<16x128xf32>
    %40 = arith.addf %39, %0 : vector<16x128xf32>
    %cst_28 = arith.constant 0.000000e+00 : f32
    %41 = vector.broadcast %cst_28 : f32 to vector<16x128xf32>
    %42 = arith.maximumf %40, %41 : vector<16x128xf32>
    %c0_29 = arith.constant 0 : index
    %c0_30 = arith.constant 0 : index
    %43 = vector.load %arg6[%c0_29, %c0_30] : memref<16x128xf32, #tpu.memory_space<vmem>>, vector<16x128xf32>
    tpu.vector_store %arg6[%c0_29, %c0_30], %42 {strides = array<i32>} : memref<16x128xf32, #tpu.memory_space<vmem>>, vector<16x128xf32>,
    return
  }
  func.func @transform_0(%arg0: i32) -> (i32, i32) {
    %c0_i32 = arith.constant 0 : i32
    %c0_i32_0 = arith.constant 0 : i32
    return %arg0, %c0_i32 : i32, i32
  }
  func.func @transform_1(%arg0: i32) -> (i32, i32, i32) {
    %c0_i32 = arith.constant 0 : i32
    %c0_i32_0 = arith.constant 0 : i32
    %c0_i32_1 = arith.constant 0 : i32
    %c0_i32_2 = arith.constant 0 : i32
    return %c0_i32, %c0_i32_0, %c0_i32_1 : i32, i32, i32
  }
  func.func @transform_2(%arg0: i32) -> (i32, i32) {
    %c0_i32 = arith.constant 0 : i32
    %c0_i32_0 = arith.constant 0 : i32
    %c0_i32_1 = arith.constant 0 : i32
    return %c0_i32, %c0_i32_0 : i32, i32
  }
  func.func @transform_3(%arg0: i32) -> (i32, i32, i32) {
    %c0_i32 = arith.constant 0 : i32
    %c0_i32_0 = arith.constant 0 : i32
    %c0_i32_1 = arith.constant 0 : i32
    %c0_i32_2 = arith.constant 0 : i32
    return %c0_i32, %c0_i32_0, %c0_i32_1 : i32, i32, i32
  }
  func.func @transform_4(%arg0: i32) -> (i32, i32) {
    %c0_i32 = arith.constant 0 : i32
    %c0_i32_0 = arith.constant 0 : i32
    %c0_i32_1 = arith.constant 0 : i32
    return %c0_i32, %c0_i32_0 : i32, i32
  }
  func.func @transform_5(%arg0: i32) -> (i32, i32) {
    %c0_i32 = arith.constant 0 : i32
    %c0_i32_0 = arith.constant 0 : i32
    return %arg0, %c0_i32 : i32, i32
  }
}

</mosaic_0001>

<bundles_post_ra>
// kernel: tpu_custom_call.1
= control target key start
LH: loop header
LB: loop body
LE: loop exit
PB: predicated region body
PF: predicated region fallthrough
CT: control target
= control target key end

     0   :  { %10 = vsyncpa [#allocation3], 0  ;;  %s1839_s0 = inlined_call_operand.hbm [shape: f32[32,128], index: 0, kind: input, shape index: {}]   ;;  %s1840_s1 = inlined_call_operand.hbm [shape: f32[3,128,128], index: 1, kind: input, shape index: {}]   ;;  %s1841_s2 = inlined_call_operand.vmem [shape: f32[1,128], index: 2, kind: input, shape index: {}]   ;;  %s1842_s3 = inlined_call_operand.hbm [shape: f32[3,128,128], index: 3, kind: input, shape index: {}]   ;;  %s1843_s4 = inlined_call_operand.vmem [shape: f32[1,128], index: 4, kind: input, shape index: {}]   ;;  %s1844_s5 = inlined_call_operand.hbm [shape: f32[32,128], index: 5, kind: output, shape index: {}]  }
   0x1   :  { %12 = vsyncpa [#allocation3 + $0x1], 0 }
   0x2   :  { %13 = vsyncpa [#allocation6], 0 }
   0x3   :  { %14 = vsyncpa [#allocation4], 0 }
   0x4   :  { %16 = vsyncpa [#allocation4 + $0x1], 0  ;;  %s1597_s18 = smov 0   ;;  %s1599_s19 = smov 0  }
   0x5   :  { %s1601_s20 = smov 0   ;;  %s1603_s21 = smov 0  }
   0x6 LB: > { %s1618_s22 = sadd.s32 4294967295, %s1557_s21   ;;  %s992_s23 = sadd.s32 4294967294, %s1557_s21   ;;  %s1557_s21 = sphi %s1603_s21, %s1869_s21   ;;  %s1553_s20 = sphi %s1601_s20, %s1868_s20   ;;  %s1549_s19 = sphi %s1599_s19, %s1867_s19   ;;  %s1545_s18 = sphi %s1597_s18, %s1866_s18  }
   0x7   : > { %p42_p0 = scmp.ne.s32.totalorder %s1549_s19, %s1545_s18  ;;  %p1845_p1 = scmp.eq.s32.totalorder %s1618_s22, 0 }
   0x8   : > { %p150_p2 = scmp.eq.s32.totalorder %s1618_s22, 1  ;;  %p156_p3 = scmp.eq.s32.totalorder %s992_s23, 1 }
   0x9   : > { %p1627_p4 = por %p1845_p1, %p42_p0  ;;  %p993_p5 = scmp.ge.s32.totalorder %s1557_s21, 1 }
   0xa   : > { %p1632_p6 = por %p156_p3, %p42_p0  ;;  %p163_p7 = scmp.lt.s32.totalorder %s1557_s21, 3 }
   0xb   : > { %s1850_s24 = scalar_select %p1627_p4, 1, 0 }
   0xc   : > { %s1851_s25 = scalar_select %p1632_p6, 1, 0 }
   0xd   : > { %p1637_p8 = pnand %p993_p5, %p163_p7  ;;  %s1559_s27 = smov [#allocation5]  }
   0xe   : > { %s175_s28 = sshll.u32 %s1559_s27, 4  ;;  %s1560_s30 = smov [#allocation7]   ;;  %s176_s28 = int_to_ptr.vmem [resolvable:$true] %s175_s28 }
   0xf   : > { %s1852_s26 = scalar_select %p1637_p8, 1, 0 }
  0x10   : > { %p1350_p9 = pneg %p1637_p8  ;;  %s191_s6 = sshll.u32 %s1560_s30, 4  ;;  %s192_s6 = int_to_ptr.vmem [resolvable:$true] %s191_s6 }
  0x11   : > { %s1420_s7 = scalar_lea.vmem %s176_s28, 6144  ;;  %p1428_p5 = scmp.lt.s32.totalorder %s176_s28, %s176_s28 }
  0x12   : > { %p1646_p11 = pnand %p1350_p9, %p1845_p1  ;;  %p1421_p13 = scmp.ne.s32.totalorder %s176_s28, %s1420_s7 }
  0x13   : > { %p1429_p7 = scmp.lt.s32.totalorder %s1420_s7, %s1420_s7 }
  0x14   : > { %p1411_p12 = pneg %p1646_p11 }
  0x15   : > { %p1430_p10 = por %p1429_p7, %p1428_p5 }
  0x16   : > { %p1423_p0 = pnand %p1421_p13, %p1411_p12 }
  0x18   : > { %p1424_p3 = pneg %p1423_p0 }
  0x1a   : > { %p1431_p9 = pnand %p1430_p10, %p1424_p3 }
  0x1c   : > { %1434 = shalt.err (!%p1431_p9)
}
  0x1d   : > { %s1846_s8 = smov 128   ;;  %s1562_s9 = smov 8  }
  0x1e   : > { %1353 = dma.hbm_to_vmem [thread:$0]  (!%p1646_p11), %s1840_s1, 6144, %s176_s28, [#allocation6], %s1846_s8, %s1846_s8, %s1562_s9  }
  0x1f   : > { %s1446_s12 = scalar_lea.vmem %s192_s6, 6144  ;;  %p1454_p10 = scmp.lt.s32.totalorder %s192_s6, %s192_s6 }
  0x20   : > { %p1447_p13 = scmp.ne.s32.totalorder %s192_s6, %s1446_s12  ;;  %p1455_p3 = scmp.lt.s32.totalorder %s1446_s12, %s1446_s12 }
  0x22   : > { %p1449_p0 = pnand %p1447_p13, %p1411_p12  ;;  %p1456_p7 = por %p1455_p3, %p1454_p10 }
  0x24   : > { %p1450_p5 = pneg %p1449_p0 }
  0x26   : > { %p1457_p9 = pnand %p1456_p7, %p1450_p5 }
  0x28   : > { %1460 = shalt.err (!%p1457_p9)
}
  0x29   : > { %1356 = dma.hbm_to_vmem [thread:$0]  (!%p1646_p11), %s1842_s3, 6144, %s192_s6, [#allocation6], %s1846_s8, %s1846_s8, %s1562_s9  }
  0x2a   : > { %s1675_s15 = sadd.s32 1, %s1557_s21   ;;  %s29_s16 = sadd.s32 1, %s1553_s20 }
  0x2b   : > { %s26_s17 = ssub.s32 %s1557_s21, %s1675_s15  ;;  %p36_p12 = scmp.ne.s32.totalorder %s1553_s20, %s1549_s19 }
  0x2c   : > { %p27_p13 = scmp.eq.s32.totalorder %s26_s17, 0  ;;  %p37_p0 = scmp.eq.s32.totalorder %s1557_s21, 0 }
  0x2d   : > { %p1685_p5 = por %p150_p2, %p36_p12  ;;  %p1367_p10 = scmp.lt.s32.totalorder %s1557_s21, 2 }
  0x2e   : > { %s1691_s27 = scalar_select %p27_p13, %s1553_s20, %s29_s16  }
  0x2f   : > { %s1854_s23 = scalar_select %p1685_p5, 1, 0 }
  0x30   : > { %p38_p3 = por %p37_p0, %p36_p12  ;;  %s208_s28 = sand.u32 1, %s1553_s20  }
  0x31   : > { %s997_s29 = sshll.u32 %s208_s28, 4  ;;  %s1018_s30 = sshll.u32 %s1557_s21, 8 }
  0x32   : > { %s1698_s10 = scalar_lea.hbm %s1839_s0, %s1018_s30  ;;  %s212_s11 = scalar_lea.vmem [#allocation2], %s997_s29 }
  0x33   : > { %s219_s12 = sshll.u32 %s212_s11, 4  ;;  %p1702_p2 = pnand %p1367_p10, %p38_p3  ;;  %s1700_s12 = int_to_ptr.vmem [resolvable:$true] %s219_s12 }
  0x34   : > { %s1706_s14 = scalar_lea.sflag [#allocation3], %s208_s28  ;;  %s1461_s16 = scalar_lea.hbm %s1698_s10, 256 }
  0x35   : > { %p1462_p11 = scmp.ne.s32.totalorder %s1698_s10, %s1461_s16  ;;  %p1463_p7 = pneg %p1702_p2 }
  0x36   : > { %s1466_s29 = scalar_lea.hbm %s1839_s0, 512  ;;  %p1467_p13 = scmp.lt.s32.totalorder %s1698_s10, %s1839_s0 }
  0x37   : > { %p1464_p9 = pnand %p1463_p7, %p1462_p11  ;;  %p1468_p0 = scmp.lt.s32.totalorder %s1466_s29, %s1461_s16 }
  0x39   : > { %p1465_p12 = pneg %p1464_p9  ;;  %p1469_p10 = por %p1468_p0, %p1467_p13 }
  0x3b   : > { %p1470_p3 = pnand %p1469_p10, %p1465_p12 }
  0x3d   : > { %1473 = shalt.err (!%p1470_p3)
}
  0x3e   : > { %s1474_s28 = scalar_lea.vmem %s1700_s12, 256  ;;  %s1563_s11 = smov [#allocation2]  }
  0x3f   : > { %p1475_p1 = scmp.ne.s32.totalorder %s1700_s12, %s1474_s28  ;;  %s1479_s8 = sshll.u32 %s1563_s11, 4  ;;  %s1480_s8 = int_to_ptr.vmem [resolvable:$false] %s1479_s8 }
  0x40   : > { %s1481_s17 = scalar_lea.vmem %s1480_s8, 512  ;;  %p1482_p9 = scmp.lt.s32.totalorder %s1700_s12, %s1480_s8 }
  0x41   : > { %p1477_p6 = pnand %p1475_p1, %p1463_p7  ;;  %p1483_p5 = scmp.lt.s32.totalorder %s1481_s17, %s1474_s28 }
  0x43   : > { %p1478_p11 = pneg %p1477_p6  ;;  %p1484_p4 = por %p1483_p5, %p1482_p9 }
  0x45   : > { %p1485_p8 = pnand %p1484_p4, %p1478_p11 }
  0x47   : > { %1488 = shalt.err (!%p1485_p8)
}
  0x48   : > { %s1856_s16 = smov 128   ;;  %p1857_p1 = scmp.ne.s32.totalorder %s1852_s26, 0 }
  0x49   : > { %1360 = dma.hbm_to_vmem [thread:$0]  (!%p1702_p2), %s1698_s10, 256, %s1700_s12, %s1706_s14, %s1856_s16, %s1856_s16, %s1562_s9  }
  0x4a   : > { %231 = sbr.rel (%p1857_p1) target bundleno = 601 (0x259), region = 40  ;;  %s1733_s30 = sand.u32 (!%p1857_p1), 1, %s1549_s19  }
  0x4b   : > { %s1001_s8 = sshll.u32 (!%p1857_p1), %s1733_s30, 4  ;;  %s234_s29 = scalar_lea.sflag (!%p1857_p1), [#allocation3], %s1733_s30 }
  0x4c   : > { %s1739_s13 = scalar_lea.vmem (!%p1857_p1), [#allocation2], %s1001_s8  ;;  %p1858_p4 = scmp.ne.s32.totalorder (!%p1857_p1), %s1850_s24, 0 }
  0x4f   : > { %1532 = dma.done.wait (%p1858_p4), %s234_s29, 256  }
  0x50   : > { %1534 = vsyncadd (%p1858_p4), %s234_s29, 4294967040  ;;  %p1859_p6 = scmp.eq.s32.totalorder %s1618_s22, 0 }
  0x52   : > { %1536 = dma.done.wait (%p1859_p6), [#allocation6], 12288   ;;  %p1860_p8 = pmov %p1859_p6 }
  0x53   : > { %v317_v0 = vld [vmem:[#allocation5 + $0xf8] sm:$0xff]  ;;  %v316_v2 = vld [vmem:[#allocation5 + $0xf0] sm:$0xff]  ;;  %v315_v4 = vld [vmem:[#allocation5 + $0xe8] sm:$0xff]  ;;  %vm278_vm0 = vcmask 1040384   ;;  %vm468_vm1 = vcmask 1046528   ;;  %s271_s12 = scalar_lea.vmem [#allocation8], %s1001_s8 }
  0x54   : > { %1538 = vsyncadd (%p1860_p8), [#allocation6], 4294955008  ;;  %v300_v1 = vld [vmem:[#allocation5 + $0x78] sm:$0xff]  ;;  %1128 = vmatprep.subr.mxu0 %v317_v0  ;;  %v299_v3 = vld [vmem:[#allocation5 + $0x70] sm:$0xff]  ;;  %s900_s14 = sshll.u32 %s271_s12, 4  ;;  %s1019_s6 = sshll.u32 %s1618_s22, 8  ;;  %s1790_s14 = int_to_ptr.vmem [resolvable:$true] %s900_s14 }
  0x55   : > { %1163 = vmatprep.subr.mxu1 %v300_v1  ;;  %1129 = vmatpush3.msra.mxu0 %v317_v0  ;;  %v298_v5 = vld [vmem:[#allocation5 + $0x68] sm:$0xff]  ;;  %v314_v6 = vld [vmem:[#allocation5 + $0xe0] sm:$0xff]  ;;  %v313_v8 = vld [vmem:[#allocation5 + $0xd8] sm:$0xff]  ;;  %s1796_s11 = scalar_lea.hbm %s1844_s5, %s1019_s6  ;;  %s887_s17 = scalar_lea.sflag [#allocation4], %s1733_s30 }
  0x56   : > { %1164 = vmatpush3.msra.mxu1 %v300_v1  ;;  %1130 = vmatprep.subr.mxu0 %v316_v2  ;;  %v297_v7 = vld [vmem:[#allocation5 + $0x60] sm:$0xff]  ;;  %v296_v9 = vld [vmem:[#allocation5 + $0x58] sm:$0xff]  ;;  %v312_v10 = vld [vmem:[#allocation5 + $0xd0] sm:$0xff]  ;;  %s1489_s16 = scalar_lea.vmem %s1790_s14, 256  ;;  %p1863_p2 = scmp.ne.s32.totalorder %s1854_s23, 0 }
  0x57   : > { %1165 = vmatprep.subr.mxu1 %v299_v3  ;;  %1131 = vmatpush3.msra.mxu0 %v316_v2  ;;  %v295_v11 = vld [vmem:[#allocation5 + $0x50] sm:$0xff]  ;;  %v311_v12 = vld [vmem:[#allocation5 + $0xc8] sm:$0xff]  ;;  %v310_v14 = vld [vmem:[#allocation5 + $0xc0] sm:$0xff]  ;;  %p1490_p5 = scmp.ne.s32.totalorder %s1790_s14, %s1489_s16  ;;  %s1564_s22 = smov [#allocation8]  }
  0x58   : > { %1166 = vmatpush3.msra.mxu1 %v299_v3  ;;  %1132 = vmatprep.subr.mxu0 %v315_v4  ;;  %v294_v13 = vld [vmem:[#allocation5 + $0x48] sm:$0xff]  ;;  %v293_v15 = vld [vmem:[#allocation5 + $0x40] sm:$0xff]  ;;  %v309_v16 = vld [vmem:[#allocation5 + $0xb8] sm:$0xff]  ;;  %s1493_s8 = sshll.u32 %s1564_s22, 4  ;;  %s1494_s8 = int_to_ptr.vmem [resolvable:$false] %s1493_s8 }
  0x59   : > { %1167 = vmatprep.subr.mxu1 %v298_v5  ;;  %1133 = vmatpush3.msra.mxu0 %v315_v4  ;;  %v292_v17 = vld [vmem:[#allocation5 + $0x38] sm:$0xff]  ;;  %v308_v18 = vld [vmem:[#allocation5 + $0xb0] sm:$0xff]  ;;  %v307_v20 = vld [vmem:[#allocation5 + $0xa8] sm:$0xff]  ;;  %p1491_p7 = pnand %p1490_p5, %p1863_p2  ;;  %s1495_s29 = scalar_lea.vmem %s1494_s8, 512 }
  0x5a   : > { %1168 = vmatpush3.msra.mxu1 %v298_v5  ;;  %1134 = vmatprep.subr.mxu0 %v314_v6  ;;  %v291_v19 = vld [vmem:[#allocation5 + $0x30] sm:$0xff]  ;;  %v290_v21 = vld [vmem:[#allocation5 + $0x28] sm:$0xff]  ;;  %v306_v22 = vld [vmem:[#allocation5 + $0xa0] sm:$0xff]  ;;  %p1496_p13 = scmp.lt.s32.totalorder %s1790_s14, %s1494_s8  ;;  %p1497_p0 = scmp.lt.s32.totalorder %s1495_s29, %s1489_s16 }
  0x5b   : > { %1169 = vmatprep.subr.mxu1 %v297_v7  ;;  %1135 = vmatpush3.msra.mxu0 %v314_v6  ;;  %v289_v23 = vld [vmem:[#allocation5 + $0x20] sm:$0xff]  ;;  %v305_v24 = vld [vmem:[#allocation5 + $0x98] sm:$0xff]  ;;  %v304_v26 = vld [vmem:[#allocation5 + $0x90] sm:$0xff]  ;;  %p1492_p12 = pneg %p1491_p7 }
  0x5c   : > { %1170 = vmatpush3.msra.mxu1 %v297_v7  ;;  %1136 = vmatprep.subr.mxu0 %v313_v8  ;;  %v288_v25 = vld [vmem:[#allocation5 + $0x18] sm:$0xff]  ;;  %v287_v27 = vld [vmem:[#allocation5 + $0x10] sm:$0xff]  ;;  %v303_v30 = vld [vmem:[#allocation5 + $0x88] sm:$0xff]  ;;  %p1498_p10 = por %p1497_p0, %p1496_p13 }
  0x5d   : > { %1171 = vmatprep.subr.mxu1 %v296_v9  ;;  %1137 = vmatpush3.msra.mxu0 %v313_v8  ;;  %v1750_v28 = vld [vmem:[%s1739_s13] sm:$0xff]  ;;  %v1753_v29 = vld [vmem:[%s1739_s13 + $0x8] sm:$0xff]  ;;  %vm1760_vm2 = vmneg %vm278_vm0 }
  0x5e   : > { %1172 = vmatpush3.msra.mxu1 %v296_v9  ;;  %1138 = vmatprep.subr.mxu0 %v312_v10  ;;  %v286_v31 = vld [vmem:[#allocation5 + $0x8] sm:$0xff]  ;;  %v279_v32 = vrot.slane %v1750_v28, 7  ;;  %v280_v33 = vrot.slane %v1753_v29, 7  ;;  %v302_v34 = vld [vmem:[#allocation5 + $0x80] sm:$0xff]  ;;  %v469_v36 = vrot.slane %v1750_v28, 1  ;;  %v470_v37 = vrot.slane %v1753_v29, 1  ;;  %p1499_p3 = pnand %p1498_p10, %p1492_p12 }
  0x5f   : > { %1173 = vmatprep.subr.mxu1 %v295_v11  ;;  %1139 = vmatpush3.msra.mxu0 %v312_v10  ;;  %v285_v35 = vld [vmem:[#allocation5] sm:$0xff]  ;;  %v491_v40 = vld [vmem:[#allocation5 + $0x178] sm:$0xff]  ;;  %v490_v42 = vld [vmem:[#allocation5 + $0x170] sm:$0xff] }
  0x60   : > { %1174 = vmatpush3.msra.mxu1 %v295_v11  ;;  %1140 = vmatprep.subr.mxu0 %v311_v12  ;;  %v281_v39 = vsel %vm278_vm0, %v279_v32, %v280_v33  ;;  %v471_v41 = vsel %vm468_vm1, %v469_v36, %v470_v37  ;;  %v489_v43 = vld [vmem:[#allocation5 + $0x168] sm:$0xff]  ;;  %v488_v44 = vld [vmem:[#allocation5 + $0x160] sm:$0xff]  ;;  %v487_v45 = vld [vmem:[#allocation5 + $0x158] sm:$0xff] }
  0x61   : > { %1175 = vmatprep.subr.mxu1 %v294_v13  ;;  %1141 = vmatpush3.msra.mxu0 %v311_v12  ;;  %v486_v46 = vld [vmem:[#allocation5 + $0x150] sm:$0xff]  ;;  %v485_v47 = vld [vmem:[#allocation5 + $0x148] sm:$0xff]  ;;  %v484_v48 = vld [vmem:[#allocation5 + $0x140] sm:$0xff] }
  0x62   : > { %1176 = vmatpush3.msra.mxu1 %v294_v13  ;;  %1142 = vmatprep.subr.mxu0 %v310_v14  ;;  %v483_v49 = vld [vmem:[#allocation5 + $0x138] sm:$0xff]  ;;  %v482_v50 = vld [vmem:[#allocation5 + $0x130] sm:$0xff]  ;;  %v481_v51 = vld [vmem:[#allocation5 + $0x128] sm:$0xff] }
  0x63   : > { %1177 = vmatprep.subr.mxu1 %v293_v15  ;;  %1143 = vmatpush3.msra.mxu0 %v310_v14  ;;  %v480_v52 = vld [vmem:[#allocation5 + $0x120] sm:$0xff]  ;;  %v479_v53 = vld [vmem:[#allocation5 + $0x118] sm:$0xff]  ;;  %v478_v54 = vld [vmem:[#allocation5 + $0x110] sm:$0xff] }
  0x64   : > { %1178 = vmatpush3.msra.mxu1 %v293_v15  ;;  %1144 = vmatprep.subr.mxu0 %v309_v16  ;;  %v477_v55 = vld [vmem:[#allocation5 + $0x108] sm:$0xff]  ;;  %v476_v56 = vld [vmem:[#allocation5 + $0x100] sm:$0xff]  ;;  %v620_v57 = vld [vmem:[#allocation7 + $0xf8] sm:$0xff] }
  0x65   : > { %1179 = vmatprep.subr.mxu1 %v292_v17  ;;  %1145 = vmatpush3.msra.mxu0 %v309_v16  ;;  %v619_v58 = vld [vmem:[#allocation7 + $0xf0] sm:$0xff]  ;;  %v603_v59 = vld [vmem:[#allocation7 + $0x78] sm:$0xff]  ;;  %v618_v61 = vld [vmem:[#allocation7 + $0xe8] sm:$0xff] }
  0x66   : > { %1180 = vmatpush3.msra.mxu1 %v292_v17  ;;  %1146 = vmatprep.subr.mxu0 %v308_v18  ;;  %v602_v60 = vld [vmem:[#allocation7 + $0x70] sm:$0xff]  ;;  %v601_v62 = vld [vmem:[#allocation7 + $0x68] sm:$0xff]  ;;  %v617_v63 = vld [vmem:[#allocation7 + $0xe0] sm:$0xff] }
  0x67   : > { %1181 = vmatprep.subr.mxu1 %v291_v19  ;;  %1147 = vmatpush3.msra.mxu0 %v308_v18  ;;  %v600_v0 = vld [vmem:[#allocation7 + $0x60] sm:$0xff]  ;;  %v616_v1 = vld [vmem:[#allocation7 + $0xd8] sm:$0xff]  ;;  %v615_v3 = vld [vmem:[#allocation7 + $0xd0] sm:$0xff] }
  0x68   : > { %1182 = vmatpush3.msra.mxu1 %v291_v19  ;;  %1148 = vmatprep.subr.mxu0 %v307_v20  ;;  %v599_v2 = vld [vmem:[#allocation7 + $0x58] sm:$0xff]  ;;  %v598_v4 = vld [vmem:[#allocation7 + $0x50] sm:$0xff]  ;;  %v614_v5 = vld [vmem:[#allocation7 + $0xc8] sm:$0xff] }
  0x69   : > { %1183 = vmatprep.subr.mxu1 %v290_v21  ;;  %1149 = vmatpush3.msra.mxu0 %v307_v20  ;;  %v597_v6 = vld [vmem:[#allocation7 + $0x48] sm:$0xff]  ;;  %v613_v7 = vld [vmem:[#allocation7 + $0xc0] sm:$0xff]  ;;  %v612_v9 = vld [vmem:[#allocation7 + $0xb8] sm:$0xff] }
  0x6a   : > { %1184 = vmatpush3.msra.mxu1 %v290_v21  ;;  %1150 = vmatprep.subr.mxu0 %v306_v22  ;;  %v596_v8 = vld [vmem:[#allocation7 + $0x40] sm:$0xff]  ;;  %v595_v10 = vld [vmem:[#allocation7 + $0x38] sm:$0xff]  ;;  %v611_v11 = vld [vmem:[#allocation7 + $0xb0] sm:$0xff] }
  0x6b   : > { %1185 = vmatprep.subr.mxu1 %v289_v23  ;;  %1151 = vmatpush3.msra.mxu0 %v306_v22  ;;  %v594_v12 = vld [vmem:[#allocation7 + $0x30] sm:$0xff]  ;;  %v610_v13 = vld [vmem:[#allocation7 + $0xa8] sm:$0xff]  ;;  %v609_v14 = vld [vmem:[#allocation7 + $0xa0] sm:$0xff] }
  0x6c   : > { %1186 = vmatpush3.msra.mxu1 %v289_v23  ;;  %1152 = vmatprep.subr.mxu0 %v305_v24  ;;  %v593_v15 = vld [vmem:[#allocation7 + $0x28] sm:$0xff]  ;;  %v608_v16 = vld [vmem:[#allocation7 + $0x98] sm:$0xff]  ;;  %v592_v17 = vld [vmem:[#allocation7 + $0x20] sm:$0xff] }
  0x6d   : > { %1187 = vmatprep.subr.mxu1 %v288_v25  ;;  %1153 = vmatpush3.msra.mxu0 %v305_v24  ;;  %v607_v18 = vld [vmem:[#allocation7 + $0x90] sm:$0xff]  ;;  %v591_v19 = vld [vmem:[#allocation7 + $0x18] sm:$0xff]  ;;  %v606_v20 = vld [vmem:[#allocation7 + $0x88] sm:$0xff] }
  0x6e   : > { %1188 = vmatpush3.msra.mxu1 %v288_v25  ;;  %1154 = vmatprep.subr.mxu0 %v304_v26  ;;  %v590_v21 = vld [vmem:[#allocation7 + $0x10] sm:$0xff]  ;;  %v605_v22 = vld [vmem:[#allocation7 + $0x80] sm:$0xff]  ;;  %v589_v23 = vld [vmem:[#allocation7 + $0x8] sm:$0xff] }
  0x6f   : > { %1189 = vmatprep.subr.mxu1 %v287_v27  ;;  %1155 = vmatpush3.msra.mxu0 %v304_v26  ;;  %v793_v24 = vld [vmem:[#allocation7 + $0x178] sm:$0xff]  ;;  %v588_v25 = vld [vmem:[#allocation7] sm:$0xff]  ;;  %v787_v38 = vld [vmem:[#allocation7 + $0x148] sm:$0xff] }
  0x70   : > { %1190 = vmatpush3.msra.mxu1 %v287_v27  ;;  %1156 = vmatprep.subr.mxu0 %v303_v30 }
  0x71   : > { %1191 = vmatprep.subr.mxu1 %v286_v31  ;;  %1157 = vmatpush3.msra.mxu0 %v303_v30 }
  0x72   : > { %1192 = vmatpush3.msra.mxu1 %v286_v31  ;;  %1158 = vmatprep.subr.mxu0 %v302_v34 }
  0x73   : > { %1193 = vmatprep.subr.mxu1 %v285_v35  ;;  %1159 = vmatpush3.msra.mxu0 %v302_v34  ;;  %v1008_v34 = vld [vmem:[%s1841_s2] ss:$0 sm:$0xff] }
  0x74   : > { %1160 = vmatprep.mubr.f32.mxu0 %v1750_v28  ;;  %1194 = vmatpush3.msra.mxu1 %v285_v35 }
  0x75   : > { %1195 = vmatprep.mubr.msk.f32.mxu1 %vm1760_vm2, %v279_v32  ;;  %1161 = vmatmul.mubr.f32.vlgmr.msra.gmra.mxu0 %v1753_v29 }
  0x76   : > { %1196 = vmatmul.mubr.f32.vlgmr.msra.gmra.mxu1 %v281_v39  ;;  %1198 = vmatprep.subr.mxu0 %v491_v40 }
  0x77   : > { %1230 = vmatprep.mubr.f32.mxu0 %v471_v41  ;;  %1199 = vmatpush3.msra.mxu0 %v491_v40 }
  0x78   : > { %1200 = vmatprep.subr.mxu0 %v490_v42  ;;  %1233 = vmatprep.subr.mxu1 %v620_v57 }
  0x79   : > { %1201 = vmatpush3.msra.mxu0 %v490_v42  ;;  %1234 = vmatpush3.msra.mxu1 %v620_v57  ;;  %v784_v57 = vld [vmem:[#allocation7 + $0x130] sm:$0xff] }
  0x7a   : > { %1202 = vmatprep.subr.mxu0 %v489_v43  ;;  %1235 = vmatprep.subr.mxu1 %v619_v58 }
  0x7b   : > { %1203 = vmatpush3.msra.mxu0 %v489_v43  ;;  %1236 = vmatpush3.msra.mxu1 %v619_v58  ;;  %v783_v58 = vld [vmem:[#allocation7 + $0x128] sm:$0xff] }
  0x7c   : > { %1204 = vmatprep.subr.mxu0 %v488_v44  ;;  %1237 = vmatprep.subr.mxu1 %v618_v61 }
  0x7d   : > { %1205 = vmatpush3.msra.mxu0 %v488_v44  ;;  %1238 = vmatpush3.msra.mxu1 %v618_v61  ;;  %v780_v61 = vld [vmem:[#allocation7 + $0x110] sm:$0xff] }
  0x7e   : > { %1206 = vmatprep.subr.mxu0 %v487_v45  ;;  %1239 = vmatprep.subr.mxu1 %v617_v63 }
  0x7f   : > { %1207 = vmatpush3.msra.mxu0 %v487_v45  ;;  %1240 = vmatpush3.msra.mxu1 %v617_v63  ;;  %v778_v63 = vld [vmem:[#allocation7 + $0x100] sm:$0xff] }
  0x80   : > { %1208 = vmatprep.subr.mxu0 %v486_v46  ;;  %1241 = vmatprep.subr.mxu1 %v616_v1 }
  0x81   : > { %1209 = vmatpush3.msra.mxu0 %v486_v46  ;;  %1242 = vmatpush3.msra.mxu1 %v616_v1  ;;  %v792_v46 = vld [vmem:[#allocation7 + $0x170] sm:$0xff] }
  0x82   : > { %1210 = vmatprep.subr.mxu0 %v485_v47  ;;  %1243 = vmatprep.subr.mxu1 %v615_v3 }
  0x83   : > { %1211 = vmatpush3.msra.mxu0 %v485_v47  ;;  %1244 = vmatpush3.msra.mxu1 %v615_v3 }
  0x84   : > { %1212 = vmatprep.subr.mxu0 %v484_v48  ;;  %1245 = vmatprep.subr.mxu1 %v614_v5 }
  0x85   : > { %1213 = vmatpush3.msra.mxu0 %v484_v48  ;;  %1246 = vmatpush3.msra.mxu1 %v614_v5 }
  0x86   : > { %1214 = vmatprep.subr.mxu0 %v483_v49  ;;  %1247 = vmatprep.subr.mxu1 %v613_v7 }
  0x87   : > { %1215 = vmatpush3.msra.mxu0 %v483_v49  ;;  %1248 = vmatpush3.msra.mxu1 %v613_v7 }
  0x88   : > { %1216 = vmatprep.subr.mxu0 %v482_v50  ;;  %1249 = vmatprep.subr.mxu1 %v612_v9 }
  0x89   : > { %1217 = vmatpush3.msra.mxu0 %v482_v50  ;;  %1250 = vmatpush3.msra.mxu1 %v612_v9 }
  0x8a   : > { %1218 = vmatprep.subr.mxu0 %v481_v51  ;;  %1251 = vmatprep.subr.mxu1 %v611_v11 }
  0x8b   : > { %1219 = vmatpush3.msra.mxu0 %v481_v51  ;;  %1252 = vmatpush3.msra.mxu1 %v611_v11  ;;  %v791_v51 = vld [vmem:[#allocation7 + $0x168] sm:$0xff] }
  0x8c   : > { %1220 = vmatprep.subr.mxu0 %v480_v52  ;;  %1253 = vmatprep.subr.mxu1 %v610_v13 }
  0x8d   : > { %1221 = vmatpush3.msra.mxu0 %v480_v52  ;;  %1254 = vmatpush3.msra.mxu1 %v610_v13  ;;  %v790_v52 = vld [vmem:[#allocation7 + $0x160] sm:$0xff] }
  0x8e   : > { %1222 = vmatprep.subr.mxu0 %v479_v53  ;;  %1255 = vmatprep.subr.mxu1 %v609_v14 }
  0x8f   : > { %1223 = vmatpush3.msra.mxu0 %v479_v53  ;;  %1256 = vmatpush3.msra.mxu1 %v609_v14  ;;  %v789_v53 = vld [vmem:[#allocation7 + $0x158] sm:$0xff] }
  0x90   : > { %1224 = vmatprep.subr.mxu0 %v478_v54  ;;  %1257 = vmatprep.subr.mxu1 %v608_v16 }
  0x91   : > { %1225 = vmatpush3.msra.mxu0 %v478_v54  ;;  %1258 = vmatpush3.msra.mxu1 %v608_v16  ;;  %v788_v54 = vld [vmem:[#allocation7 + $0x150] sm:$0xff] }
  0x92   : > { %1226 = vmatprep.subr.mxu0 %v477_v55  ;;  %1259 = vmatprep.subr.mxu1 %v607_v18 }
  0x93   : > { %1227 = vmatpush3.msra.mxu0 %v477_v55  ;;  %1260 = vmatpush3.msra.mxu1 %v607_v18  ;;  %v786_v55 = vld [vmem:[#allocation7 + $0x140] sm:$0xff] }
  0x94   : > { %1228 = vmatprep.subr.mxu0 %v476_v56  ;;  %1261 = vmatprep.subr.mxu1 %v606_v20 }
  0x95   : > { %1229 = vmatpush3.msra.mxu0 %v476_v56  ;;  %1262 = vmatpush3.msra.mxu1 %v606_v20  ;;  %v785_v56 = vld [vmem:[#allocation7 + $0x138] sm:$0xff] }
  0x96   : > { %1231 = vmatmul.mubr.msk.f32.vlgmr.msra.gmra.mxu0 %vm468_vm1, %v470_v37  ;;  %1268 = vmatprep.subr.mxu0 %v603_v59 }
  0x97   : > { %1269 = vmatpush3.msra.mxu0 %v603_v59  ;;  %1263 = vmatprep.subr.mxu1 %v605_v22  ;;  %v782_v59 = vld [vmem:[#allocation7 + $0x120] sm:$0xff] }
  0x98   : > { %1270 = vmatprep.subr.mxu0 %v602_v60  ;;  %1264 = vmatpush3.msra.mxu1 %v605_v22 }
  0x99   : > { %1271 = vmatpush3.msra.mxu0 %v602_v60  ;;  %1303 = vmatprep.subr.mxu1 %v793_v24  ;;  %v781_v60 = vld [vmem:[#allocation7 + $0x118] sm:$0xff] }
  0x9a   : > { %1272 = vmatprep.subr.mxu0 %v601_v62 }
  0x9b   : > { %1273 = vmatpush3.msra.mxu0 %v601_v62  ;;  %v779_v62 = vld [vmem:[#allocation7 + $0x108] sm:$0xff] }
  0x9c   : > { %1274 = vmatprep.subr.mxu0 %v600_v0 }
  0x9d   : > { %1275 = vmatpush3.msra.mxu0 %v600_v0 }
  0x9e   : > { %1276 = vmatprep.subr.mxu0 %v599_v2 }
  0x9f   : > { %1277 = vmatpush3.msra.mxu0 %v599_v2 }
  0xa0   : > { %1278 = vmatprep.subr.mxu0 %v598_v4 }
  0xa1   : > { %1279 = vmatpush3.msra.mxu0 %v598_v4 }
  0xa2   : > { %1280 = vmatprep.subr.mxu0 %v597_v6 }
  0xa3   : > { %1281 = vmatpush3.msra.mxu0 %v597_v6  ;;  %v1012_v6 = vld [vmem:[%s1843_s4] ss:$0 sm:$0xff] }
  0xa4   : > { %1282 = vmatprep.subr.mxu0 %v596_v8 }
  0xa5   : > { %1283 = vmatpush3.msra.mxu0 %v596_v8 }
  0xa6   : > { %1284 = vmatprep.subr.mxu0 %v595_v10 }
  0xa7   : > { %1285 = vmatpush3.msra.mxu0 %v595_v10 }
  0xa8   : > { %1286 = vmatprep.subr.mxu0 %v594_v12 }
  0xa9   : > { %1287 = vmatpush3.msra.mxu0 %v594_v12 }
  0xaa   : > { %1288 = vmatprep.subr.mxu0 %v593_v15 }
  0xab   : > { %1289 = vmatpush3.msra.mxu0 %v593_v15 }
  0xac   : > { %1290 = vmatprep.subr.mxu0 %v592_v17 }
  0xad   : > { %1291 = vmatpush3.msra.mxu0 %v592_v17 }
  0xae   : > { %1292 = vmatprep.subr.mxu0 %v591_v19 }
  0xaf   : > { %1293 = vmatpush3.msra.mxu0 %v591_v19 }
  0xb0   : > { %1294 = vmatprep.subr.mxu0 %v590_v21 }
  0xb1   : > { %1295 = vmatpush3.msra.mxu0 %v590_v21 }
  0xb2   : > { %1296 = vmatprep.subr.mxu0 %v589_v23 }
  0xb3   : > { %1297 = vmatpush3.msra.mxu0 %v589_v23 }
  0xb4   : > { %1298 = vmatprep.subr.mxu0 %v588_v25 }
  0xb5   : > { %1299 = vmatpush3.msra.mxu0 %v588_v25 }
 0x135   : > { %v1162_v26 = vpop.f32.mrf.mxu0 }
 0x136   : > { %v1197_v27 = vpop.f32.mrf.mxu1 }
 0x137   : > { %v384_v30 = vpop.f32.mrf.mxu0  ;;  %v465_v32 = vadd.f32 %v1197_v27, %v1162_v26 }
 0x138   : > { %v459_v31 = vpop.f32.mrf.mxu1 }
 0x139   : > { %v460_v35 = vadd.f32 %v459_v31, %v384_v30 }
 0x156   : > { %v1232_v33 = vpop.f32.mrf.mxu0 }
 0x157   : > { %v568_v36 = vadd.f32 %v1232_v33, %v465_v32 }
 0x158   : > { %v558_v37 = vpop.f32.mrf.mxu0 }
 0x159   : > { %v577_v39 = vadd.f32 %v1008_v34, %v568_v36  ;;  %v567_v40 = vadd.f32 %v558_v37, %v460_v35 }
 0x15b   : > { %v579_v41 = vmax.f32 %v577_v39, 0.0  ;;  %v576_v42 = vadd.f32 %v1008_v34, %v567_v40 }
 0x15d   : > { %v578_v43 = vmax.f32 %v576_v42, 0.0  ;;  %v583_v44 = vrot.slane %v579_v41, 7  ;;  %v772_v48 = vrot.slane %v579_v41, 1 }
 0x15f   : > { %1265 = vmatprep.mubr.f32.mxu1 %v578_v43  ;;  %v582_v45 = vrot.slane %v578_v43, 7  ;;  %v771_v47 = vrot.slane %v578_v43, 1 }
 0x160   : > { %1266 = vmatmul.mubr.f32.vlgmr.msra.gmra.mxu1 %v579_v41 }
 0x161   : > { %1304 = vmatpush3.msra.mxu1 %v793_v24  ;;  %1300 = vmatprep.mubr.msk.f32.mxu0 %vm1760_vm2, %v582_v45  ;;  %v584_v49 = vsel %vm278_vm0, %v582_v45, %v583_v44  ;;  %v773_v50 = vsel %vm468_vm1, %v771_v47, %v772_v48 }
 0x162   : > { %1305 = vmatprep.subr.mxu1 %v792_v46  ;;  %1301 = vmatmul.mubr.f32.vlgmr.msra.gmra.mxu0 %v584_v49 }
 0x163   : > { %1306 = vmatpush3.msra.mxu1 %v792_v46  ;;  %1335 = vmatprep.mubr.f32.mxu1 %v773_v50 }
 0x164   : > { %1307 = vmatprep.subr.mxu1 %v791_v51 }
 0x165   : > { %1308 = vmatpush3.msra.mxu1 %v791_v51 }
 0x166   : > { %1309 = vmatprep.subr.mxu1 %v790_v52 }
 0x167   : > { %1310 = vmatpush3.msra.mxu1 %v790_v52 }
 0x168   : > { %1311 = vmatprep.subr.mxu1 %v789_v53 }
 0x169   : > { %1312 = vmatpush3.msra.mxu1 %v789_v53 }
 0x16a   : > { %1313 = vmatprep.subr.mxu1 %v788_v54 }
 0x16b   : > { %1314 = vmatpush3.msra.mxu1 %v788_v54 }
 0x16c   : > { %1315 = vmatprep.subr.mxu1 %v787_v38 }
 0x16d   : > { %1316 = vmatpush3.msra.mxu1 %v787_v38 }
 0x16e   : > { %1317 = vmatprep.subr.mxu1 %v786_v55 }
 0x16f   : > { %1318 = vmatpush3.msra.mxu1 %v786_v55 }
 0x170   : > { %1319 = vmatprep.subr.mxu1 %v785_v56 }
 0x171   : > { %1320 = vmatpush3.msra.mxu1 %v785_v56 }
 0x172   : > { %1321 = vmatprep.subr.mxu1 %v784_v57 }
 0x173   : > { %1322 = vmatpush3.msra.mxu1 %v784_v57 }
 0x174   : > { %1323 = vmatprep.subr.mxu1 %v783_v58 }
 0x175   : > { %1324 = vmatpush3.msra.mxu1 %v783_v58 }
 0x176   : > { %1325 = vmatprep.subr.mxu1 %v782_v59 }
 0x177   : > { %1326 = vmatpush3.msra.mxu1 %v782_v59 }
 0x178   : > { %1327 = vmatprep.subr.mxu1 %v781_v60 }
 0x179   : > { %1328 = vmatpush3.msra.mxu1 %v781_v60 }
 0x17a   : > { %1329 = vmatprep.subr.mxu1 %v780_v61 }
 0x17b   : > { %1330 = vmatpush3.msra.mxu1 %v780_v61 }
 0x17c   : > { %1331 = vmatprep.subr.mxu1 %v779_v62 }
 0x17d   : > { %1332 = vmatpush3.msra.mxu1 %v779_v62 }
 0x17e   : > { %1333 = vmatprep.subr.mxu1 %v778_v63 }
 0x17f   : > { %1334 = vmatpush3.msra.mxu1 %v778_v63 }
 0x180   : > { %1336 = vmatmul.mubr.msk.f32.vlgmr.msra.gmra.mxu1 %vm468_vm1, %v772_v48 }
 0x220   : > { %v1267_v0 = vpop.f32.mrf.mxu1 }
 0x222   : > { %v1302_v1 = vpop.f32.mrf.mxu0  ;;  %v687_v2 = vpop.f32.mrf.mxu1 }
 0x223   : > { %v768_v4 = vadd.f32 %v1302_v1, %v1267_v0 }
 0x224   : > { %v762_v3 = vpop.f32.mrf.mxu0 }
 0x225   : > { %v763_v7 = vadd.f32 %v762_v3, %v687_v2 }
 0x240   : > { %v1337_v5 = vpop.f32.mrf.mxu1 }
 0x241   : > { %v870_v8 = vadd.f32 %v1337_v5, %v768_v4 }
 0x242   : > { %v860_v9 = vpop.f32.mrf.mxu1 }
 0x243   : > { %v879_v10 = vadd.f32 %v1012_v6, %v870_v8  ;;  %v869_v11 = vadd.f32 %v860_v9, %v763_v7 }
 0x245   : > { %v881_v12 = vadd.f32 %v879_v10, %v1753_v29  ;;  %v878_v13 = vadd.f32 %v1012_v6, %v869_v11 }
 0x247   : > { %v883_v14 = vmax.f32 %v881_v12, 0.0  ;;  %v880_v15 = vadd.f32 %v878_v13, %v1750_v28 }
 0x249   : > { %885 = vst [vmem:[%s271_s12 + $0x8] sm:$0xff] %v883_v14  ;;  %v882_v16 = vmax.f32 %v880_v15, 0.0 }
 0x24b   : > { %884 = vst [vmem:[%s271_s12] sm:$0xff] %v882_v16 }
 0x24c   : > { %1502 = shalt.err (!%p1499_p3)
}
 0x24d   : > { %s1503_s13 = scalar_lea.hbm %s1796_s11, 256  ;;  %s1507_s9 = scalar_lea.hbm %s1844_s5, 512 }
 0x24e   : > { %p1504_p11 = scmp.ne.s32.totalorder %s1796_s11, %s1503_s13  ;;  %p1508_p4 = scmp.lt.s32.totalorder %s1796_s11, %s1844_s5 }
 0x24f   : > { %p1509_p6 = scmp.lt.s32.totalorder %s1507_s9, %s1503_s13 }
 0x250   : > { %p1505_p9 = pnand %p1504_p11, %p1863_p2 }
 0x251   : > { %p1510_p8 = por %p1509_p6, %p1508_p4 }
 0x252   : > { %p1506_p1 = pneg %p1505_p9 }
 0x254   : > { %p1511_p5 = pnand %p1510_p8, %p1506_p1 }
 0x256   : > { %1514 = shalt.err (!%p1511_p5)
}
 0x257   : > { %s1565_s6 = smov 128   ;;  %s1566_s7 = smov 8  }
 0x258   : > { %1348 = dma.vmem_to_hbm [thread:$0]  (%p1863_p2), %s1790_s14, 256, %s1796_s11, %s887_s17, %s1565_s6, %s1565_s6, %s1566_s7  }
 0x259 PF: > { %s915_s28 = sand.u32 1, %s1545_s18   ;;  %p1864_p7 = scmp.ne.s32.totalorder %s1851_s25, 0 }
 0x25a   : > { %p1865_p12 = scmp.ge.s32.totalorder %s1557_s21, 2  ;;  %s916_s16 = scalar_lea.sflag [#allocation4], %s915_s28 }
 0x25c   : > { %p1362_p13 = pnand %p1865_p12, %p1864_p7 }
 0x25e   : > { %p1363_p0 = pneg %p1362_p13 }
 0x260   : > { %1540 = dma.done.wait (%p1363_p0), %s916_s16, 256  }
 0x261   : > { %1542 = vsyncadd (%p1363_p0), %s916_s16, 4294967040  ;;  %p19_p10 = scmp.ge.s32.totalorder %s1675_s15, 4   ;;  %s1866_s18 = smov %s1549_s19 }
 0x262   : > { %s1867_s19 = smov %s1553_s20  ;;  %s1868_s20 = smov %s1691_s27 }
 0x263   : > { %s1869_s21 = smov %s1675_s15  ;;  %21 = sbr.rel (!%p19_p10) target bundleno = 6 (0x6), region = 97 }
 0x268   :  { %921 = vsyncpa [#allocation3], 1 }
 0x269   :  { %923 = vsyncpa [#allocation3 + $0x1], 1 }
 0x26a   :  { %924 = vsyncpa [#allocation6], 1 }
 0x26b   :  { %925 = vsyncpa [#allocation4], 1 }
 0x26c   :  { %927 = vsyncpa [#allocation4 + $0x1], 1 }

</bundles_post_ra>
